<compile_context>
chip_gen: v5e
topology: v5e:2x2
jax: 0.10.0
libtpu: 0.0.40
codegen_flags: <defaults>
</compile_context>

<pallas_src>
import jax
import jax.numpy as jnp
from jax.experimental import pallas as pl
from jax.experimental.pallas import tpu as pltpu

_LANE = 128
_VMEM_BUDGET = 12 * 1024 * 1024  # conservative: fits v5e's 16 MiB scoped default


def _round_up(x, m):
    return ((x + m - 1) // m) * m


def _linear_kernel(x_ref, w_ref, b_ref, o_ref):
    # One MXU pass per batch tile.  W/b have constant index_maps so they stay
    # VMEM-resident across the whole grid; per-step HBM traffic is just the x
    # tile in and the y tile out (double-buffered DMA overlaps the matmul).
    acc = jnp.dot(x_ref[...], w_ref[...], preferred_element_type=jnp.float32)
    o_ref[...] = (acc + b_ref[...]).astype(o_ref.dtype)


def _plan_rows(n_rows, bytes_per_row_2buf, sublane, min_rows, requested=None):
    """Pick the batch-tile row count: fit the VMEM budget, target ~8 grid steps
    (v7x megacore + DMA overlap) but never drop below `min_rows` rows, and use a
    single exact full-array block when everything fits in one tile."""
    vmem_cap = max(sublane, (_VMEM_BUDGET // bytes_per_row_2buf) // sublane * sublane)
    if requested is None:
        want = _round_up(max(min_rows, pl.cdiv(n_rows, 8)), sublane)
    else:
        want = _round_up(max(1, requested), sublane)
    rows = min(vmem_cap, want, _round_up(n_rows, sublane))
    if rows >= n_rows:
        rows = n_rows  # block == full array (always a legal block shape)
    return rows


def _forward_plain(x, w, b2d, *, tm, sublane):
    """General path: streamed (rows, obs_dim) x-tiles, ragged last block."""
    B, obs_dim = x.shape
    act_dim = w.shape[1]
    itemsize = x.dtype.itemsize
    # VMEM bytes per batch row: x + y block buffers, lane-padded to 128,
    # double-buffered by the pipeline.
    bpr = 2 * (_round_up(obs_dim, _LANE) + _round_up(act_dim, _LANE)) * itemsize
    rows = _plan_rows(B, bpr, sublane, min_rows=4096, requested=tm)
    grid = (pl.cdiv(B, rows),)

    cost = pl.CostEstimate(
        flops=2 * B * obs_dim * act_dim,
        transcendentals=0,
        bytes_accessed=(B * obs_dim + obs_dim * act_dim + B * act_dim) * itemsize
        + act_dim * 4,
    )
    return pl.pallas_call(
        _linear_kernel,
        out_shape=jax.ShapeDtypeStruct((B, act_dim), x.dtype),
        grid=grid,
        in_specs=[
            pl.BlockSpec((rows, obs_dim), lambda i: (i, 0)),      # streamed x
            pl.BlockSpec((obs_dim, act_dim), lambda i: (0, 0)),   # resident W
            pl.BlockSpec((1, act_dim), lambda i: (0, 0)),         # resident b
        ],
        out_specs=pl.BlockSpec((rows, act_dim), lambda i: (i, 0)),
        compiler_params=pltpu.CompilerParams(dimension_semantics=("parallel",)),
        cost_estimate=cost,
    )(x, w, b2d)


def _forward_packed(x, w, b, *, tm, sublane, pack):
    """Lane-dense path: pack `pack` batch rows per lane-row via a block-diagonal
    weight so loads/stores use all 128 lanes.  Requires B % pack == 0."""
    B, obs_dim = x.shape
    act_dim = w.shape[1]
    itemsize = x.dtype.itemsize
    Bp, Kp, Np = B // pack, pack * obs_dim, pack * act_dim   # Np == 128

    # Free row-major reinterpretation: [B, obs_dim] -> [B/pack, pack*obs_dim].
    xp = x.reshape(Bp, Kp)
    # Block-diagonal weight (pack copies of W on the diagonal) + tiled bias.
    # TODO(synk): in a real model, hoist/cache this weight prep outside the step.
    wp = jnp.kron(jnp.eye(pack, dtype=w.dtype), w)                 # [Kp, Np]
    bp = jnp.tile(b.astype(jnp.float32), pack).reshape(1, Np)      # [1, Np]

    bpr = 2 * (Kp + Np) * itemsize  # lane-dense x-in + y-out, double-buffered
    rows = _plan_rows(Bp, bpr, sublane, min_rows=512,
                      requested=None if tm is None else max(1, tm // pack))
    grid = (pl.cdiv(Bp, rows),)

    cost = pl.CostEstimate(
        flops=2 * B * obs_dim * act_dim,
        transcendentals=0,
        bytes_accessed=(B * obs_dim + Kp * Np + B * act_dim) * itemsize + Np * 4,
    )
    yp = pl.pallas_call(
        _linear_kernel,
        out_shape=jax.ShapeDtypeStruct((Bp, Np), x.dtype),
        grid=grid,
        in_specs=[
            pl.BlockSpec((rows, Kp), lambda i: (i, 0)),   # streamed x, 128 lanes used
            pl.BlockSpec((Kp, Np), lambda i: (0, 0)),     # resident block-diag W
            pl.BlockSpec((1, Np), lambda i: (0, 0)),      # resident tiled bias
        ],
        out_specs=pl.BlockSpec((rows, Np), lambda i: (i, 0)),  # lane-dense stores
        compiler_params=pltpu.CompilerParams(dimension_semantics=("parallel",)),
        cost_estimate=cost,
    )(xp, wp, bp)
    return yp.reshape(B, act_dim)   # free row-major reshape back to [B, act_dim]


def baseline_forward(x, w, b, *, tm=None, compute_dtype=None,
                     small_batch_threshold=1024, allow_lane_pack=True):
    """Pallas implementation of Baseline.forward (one nn.Linear): y = x @ W + b."""
    B, obs_dim = x.shape
    obs_dim_w, act_dim = w.shape
    assert obs_dim == obs_dim_w
    assert b.shape == (act_dim,)

    if compute_dtype is not None and x.dtype != jnp.dtype(compute_dtype):
        # Opt-in only: a standalone cast costs its own HBM round trip; it pays
        # off only when the caller already produces bf16 or can fuse the cast.
        x = x.astype(compute_dtype)
    if w.dtype != x.dtype:
        w = w.astype(x.dtype)

    if B <= small_batch_threshold:
        # Tiny batches are pure launch/DMA-setup overhead for a custom kernel.
        return (jnp.dot(x, w, preferred_element_type=jnp.float32)
                + b[None, :]).astype(x.dtype)

    sublane = 16 if x.dtype.itemsize < 4 else 8   # bf16 packs 2 rows / sublane
    b2d = b.astype(jnp.float32).reshape(1, act_dim)

    pack = _LANE // act_dim if (act_dim <= _LANE and _LANE % act_dim == 0) else 1
    # Lane-dense packing is bit-equivalent for finite inputs; an Inf/NaN row
    # would contaminate the other rows packed with it (0 * Inf = NaN), so it is
    # gated behind `allow_lane_pack`.
    if (allow_lane_pack and pack > 1 and B % pack == 0
            and pack * obs_dim <= 4096):          # keep the block-diag W small
        return _forward_packed(x, w, b, tm=tm, sublane=sublane, pack=pack)
    return _forward_plain(x, w, b2d, tm=tm, sublane=sublane)


def init_linear_params(key, obs_dim, act_dim, dtype=jnp.float32):
    """Deterministic init mirroring torch.nn.Linear's default
    (uniform in +/- 1/sqrt(fan_in)).  W stored as [obs_dim, act_dim]."""
    kw, kb = jax.random.split(key)
    bound = 1.0 / jnp.sqrt(jnp.asarray(obs_dim, dtype=jnp.float32))
    w = jax.random.uniform(kw, (obs_dim, act_dim), dtype, -bound, bound)
    b = jax.random.uniform(kb, (act_dim,), dtype, -bound, bound)
    return w, b


if __name__ == "__main__":
    obs_dim, act_dim = 32, 8
    key = jax.random.PRNGKey(0)
    kx, kp, kx2, kx3 = jax.random.split(key, 4)
    w, b = init_linear_params(kp, obs_dim, act_dim)

    def ref(xin):
        return xin.astype(jnp.float32) @ w + b[None, :]

    # 1) Module's toy shape (batch=2) -- force the Pallas path (plain, single block).
    x_small = jax.random.normal(kx, (2, obs_dim), dtype=jnp.float32)
    y_small = baseline_forward(x_small, w, b, small_batch_threshold=0)
    jax.block_until_ready(y_small)
    assert y_small.shape == (2, act_dim)
    assert jnp.allclose(y_small, ref(x_small), atol=1e-5, rtol=1e-5)

    # 2) Lane-dense packed path (B % 16 == 0): full-128-lane loads and stores.
    x_pack = jax.random.normal(kx2, (4096, obs_dim), dtype=jnp.float32)
    y_pack = baseline_forward(x_pack, w, b)
    jax.block_until_ready(y_pack)
    assert y_pack.shape == (4096, act_dim)
    assert jnp.allclose(y_pack, ref(x_pack), atol=1e-4, rtol=1e-4)

    # 3) Ragged batch, tile < B: exercises the cdiv grid + masked boundary block
    #    (no pad / slice round trip).
    x_rag = jax.random.normal(kx3, (1500, obs_dim), dtype=jnp.float32)
    y_rag = baseline_forward(x_rag, w, b, tm=1024, small_batch_threshold=0)
    jax.block_until_ready(y_rag)
    assert y_rag.shape == (1500, act_dim)
    assert jnp.allclose(y_rag, ref(x_rag), atol=1e-5, rtol=1e-5)

    # 4) bf16 inputs (halves x HBM traffic when upstream already yields bf16);
    #    f32 MXU accumulation, bf16 output.
    x_bf = x_pack.astype(jnp.bfloat16)
    y_bf = baseline_forward(x_bf, w, b)
    jax.block_until_ready(y_bf)
    ref_bf = (x_bf.astype(jnp.float32)
              @ w.astype(jnp.bfloat16).astype(jnp.float32) + b[None, :])
    assert y_bf.shape == (4096, act_dim)
    assert jnp.allclose(y_bf.astype(jnp.float32), ref_bf, atol=2e-2, rtol=2e-2)

    print("KERNEL_OK")
</pallas_src>

<mosaic_0001>
module attributes {stable_mosaic.version = 11 : i64} {
  func.func @_linear_kernel(%arg0: i32, %arg1: memref<2x32xf32, #tpu.memory_space<vmem>>, %arg2: memref<32x8xf32, #tpu.memory_space<vmem>>, %arg3: memref<1x8xf32, #tpu.memory_space<vmem>>, %arg4: memref<2x8xf32, #tpu.memory_space<vmem>>) attributes {dimension_semantics = [#tpu.dimension_semantics<parallel>], iteration_bounds = array<i64: 1>, scalar_prefetch = 0 : i64, scratch_operands = 0 : i64, tpu.core_type = #tpu.core_type<tc>, window_params = [{transform_indices = @transform_0, window_bounds = array<i64: 2, 32>}, {pipeline_mode = #tpu.pipeline_mode<synchronous>, transform_indices = @transform_1, window_bounds = array<i64: 32, 8>}, {pipeline_mode = #tpu.pipeline_mode<synchronous>, transform_indices = @transform_2, window_bounds = array<i64: 1, 8>}, {transform_indices = @transform_3, window_bounds = array<i64: 2, 8>}]} {
    %c0 = arith.constant 0 : index
    %c0_0 = arith.constant 0 : index
    %0 = vector.load %arg1[%c0, %c0_0] : memref<2x32xf32, #tpu.memory_space<vmem>>, vector<2x32xf32>
    %c0_1 = arith.constant 0 : index
    %c0_2 = arith.constant 0 : index
    %1 = vector.load %arg2[%c0_1, %c0_2] : memref<32x8xf32, #tpu.memory_space<vmem>>, vector<32x8xf32>
    %cst = arith.constant dense<0.000000e+00> : vector<2x8xf32>
    %2 = tpu.matmul %0, %1, %cst {dimension_numbers = #tpu.dot_dimension_numbers<[1], [0], [0], [1], [0, 0, 1, 1], [], []>} : vector<2x32xf32>, vector<32x8xf32>, vector<2x8xf32> -> vector<2x8xf32>
    %c0_3 = arith.constant 0 : index
    %c0_4 = arith.constant 0 : index
    %3 = vector.load %arg3[%c0_3, %c0_4] : memref<1x8xf32, #tpu.memory_space<vmem>>, vector<1x8xf32>
    %4 = vector.broadcast %3 : vector<1x8xf32> to vector<2x8xf32>
    %5 = arith.addf %2, %4 : vector<2x8xf32>
    %c0_5 = arith.constant 0 : index
    %c0_6 = arith.constant 0 : index
    %6 = vector.load %arg4[%c0_5, %c0_6] : memref<2x8xf32, #tpu.memory_space<vmem>>, vector<2x8xf32>
    tpu.vector_store %arg4[%c0_5, %c0_6], %5 {strides = array<i32>} : memref<2x8xf32, #tpu.memory_space<vmem>>, vector<2x8xf32>,
    return
  }
  func.func @transform_0(%arg0: i32) -> (i32, i32) {
    %c0_i32 = arith.constant 0 : i32
    %c0_i32_0 = arith.constant 0 : i32
    return %arg0, %c0_i32 : i32, i32
  }
  func.func @transform_1(%arg0: i32) -> (i32, i32) {
    %c0_i32 = arith.constant 0 : i32
    %c0_i32_0 = arith.constant 0 : i32
    %c0_i32_1 = arith.constant 0 : i32
    return %c0_i32, %c0_i32_0 : i32, i32
  }
  func.func @transform_2(%arg0: i32) -> (i32, i32) {
    %c0_i32 = arith.constant 0 : i32
    %c0_i32_0 = arith.constant 0 : i32
    %c0_i32_1 = arith.constant 0 : i32
    return %c0_i32, %c0_i32_0 : i32, i32
  }
  func.func @transform_3(%arg0: i32) -> (i32, i32) {
    %c0_i32 = arith.constant 0 : i32
    %c0_i32_0 = arith.constant 0 : i32
    return %arg0, %c0_i32 : i32, i32
  }
}

</mosaic_0001>

<bundles_post_ra>
// kernel: tpu_custom_call.1
= control target key start
LH: loop header
LB: loop body
LE: loop exit
PB: predicated region body
PF: predicated region fallthrough
CT: control target
= control target key end

     0   :  { %s137_s0 = inlined_call_operand.vmem [shape: f32[2,32], index: 0, kind: input, shape index: {}]   ;;  %s138_s1 = inlined_call_operand.vmem [shape: f32[32,8], index: 1, kind: input, shape index: {}]   ;;  %s139_s2 = inlined_call_operand.vmem [shape: f32[1,8], index: 2, kind: input, shape index: {}]   ;;  %s140_s3 = inlined_call_operand.hbm [shape: f32[2,8], index: 3, kind: output, shape index: {}]  }
   0x1   :  { %v19_v0 = vld [vmem:[%s138_s1 + $0x18] sm:$0xff]  ;;  %v18_v1 = vld [vmem:[%s138_s1 + $0x10] sm:$0xff]  ;;  %v17_v2 = vld [vmem:[%s138_s1 + $0x8] sm:$0xff] }
   0x2   :  { %40 = vmatpush.msra.mxu0 %v19_v0 }
   0x3   :  { %8 = vsyncpa [#allocation3], 0  ;;  %v16_v3 = vld [vmem:[%s138_s1] sm:$0xff]  ;;  %vm24_vm0 = vcmask 261120   ;;  %s95_s24 = smov [#allocation2]   ;;  %s57_s28 = sshll.u32 %s140_s3, 4  ;;  %s58_s28 = int_to_ptr.hbm [resolvable:$true] %s57_s28 }
   0x4   :  { %41 = vmatpush.msra.mxu0 %v18_v1  ;;  %v15_v4 = vld [vmem:[%s137_s0] sm:$0x3]  ;;  %s55_s25 = sshll.u32 %s95_s24, 4  ;;  %vm48_vm1 = vcmask 58368   ;;  %s56_s25 = int_to_ptr.vmem [resolvable:$true] %s55_s25 }
   0x5   :  { %v68_v5 = vld [vmem:[%s139_s2] ss:$0 sm:$0xff] }
   0x6   :  { %42 = vmatpush.msra.mxu0 %v17_v2 }
   0x8   :  { %43 = vmatpush.msra.mxu0 %v16_v3 }
   0x9   :  { %66 = vmatmul.msk.f32.vlgmr.msra.gmra.mxu0 %vm24_vm0, %v15_v4 }
  0x86   :  { %v45_v6 = vpop.f32.mrf.mxu0 }
  0x87   :  { %v46_v7 = vadd.f32 %v68_v5, %v45_v6 }
  0x89   :  { %49 = vst.msk [vmem:[#allocation2] sm:$0x3] %vm48_vm1, %v46_v7 }
  0x8a   :  { %60 = dma.vmem_to_hbm [thread:$0]  %s56_s25, 32, %s58_s28, [#allocation3]  }
  0x8b   :  { %93 = dma.done.wait [#allocation3], 32  }
  0x8c   :  { %94 = vsyncadd [#allocation3], 4294967264 }
  0x8d   :  { %65 = vsyncpa [#allocation3], 1 }

</bundles_post_ra>
